<compile_context>
chip_gen: v6e
topology: v6e:2x2x1
jax: 0.10.0
libtpu: 0.0.40
codegen_flags: <defaults>
</compile_context>

<pallas_src>
import math

import jax
import jax.numpy as jnp
from jax.experimental import pallas as pl
from jax.experimental.pallas import tpu as pltpu  # noqa: F401  (TPU backend)


def _affine_kernel(x_ref, wb_ref, o_ref):
    # x_ref : (1, IN)        input row (lanes = IN)
    # wb_ref: (IN + 1, OUT)  W^T with the bias appended as the last row
    # o_ref : (1, OUT)       lane-dense output row
    in_f = x_ref.shape[1]
    wb = wb_ref[...]                       # (IN+1, OUT), single small tile
    w_t = wb[:in_f, :]                     # (IN, OUT)
    b = wb[in_f:, :]                       # (1, OUT)
    y = jnp.dot(x_ref[...], w_t, preferred_element_type=jnp.float32) + b
    o_ref[...] = y.astype(o_ref.dtype)


def _linear_cat_pallas(x, wb):
    """Flattened (OUT,) result of x @ W.T + b for a single input row x (1, IN)."""
    B, IN = x.shape
    OUT = wb.shape[1]
    out_row = pl.pallas_call(
        _affine_kernel,
        out_shape=jax.ShapeDtypeStruct((B, OUT), x.dtype),
        in_specs=[
            pl.BlockSpec((B, IN), lambda: (0, 0)),
            pl.BlockSpec((IN + 1, OUT), lambda: (0, 0)),
        ],
        out_specs=pl.BlockSpec((B, OUT), lambda: (0, 0)),
    )(x, wb)
    # Metadata-only flatten; emulates torch.cat over the iterated rows of v1.
    return out_row.reshape(-1)


_forward = jax.jit(_linear_cat_pallas)


class ModelPallas:
    """JAX/Pallas equivalent of the PyTorch Model."""

    def __init__(self, key):
        in_f, out_f = 8, 8
        k_w, k_b = jax.random.split(key)
        bound = 1.0 / math.sqrt(in_f)
        # PyTorch nn.Linear default init: U(-1/sqrt(in), 1/sqrt(in)),
        # weight stored in PyTorch layout (out_features, in_features).
        self.wt = jax.random.uniform(
            k_w, (out_f, in_f), jnp.float32, minval=-bound, maxval=bound
        )
        self.b = jax.random.uniform(
            k_b, (out_f,), jnp.float32, minval=-bound, maxval=bound
        )
        # Augmented operand built once: W^T with the bias folded in as the
        # last row -> (IN + 1, OUT).
        self.wb = jnp.concatenate(
            [self.wt.T, self.b.reshape(1, out_f)], axis=0
        )

    def __call__(self, x1):
        return _forward(x1, self.wb)  # (8,)


if __name__ == "__main__":
    key = jax.random.PRNGKey(0)
    k_model, k_x = jax.random.split(key)

    model = ModelPallas(k_model)
    x1 = jax.random.normal(k_x, (1, 8), dtype=jnp.float32)

    out = model(x1)
    jax.block_until_ready(out)

    # Sanity check vs plain-JAX reference (linear + emulated cat == flatten).
    ref = (x1 @ model.wt.T + model.b).reshape(-1)
    assert out.shape == (8,)
    assert jnp.allclose(out, ref, atol=1e-5), "mismatch vs reference"

    print("KERNEL_OK")
</pallas_src>

<mosaic_0001>
module attributes {stable_mosaic.version = 11 : i64} {
  func.func @_affine_kernel(%arg0: memref<1x8xf32, #tpu.memory_space<vmem>>, %arg1: memref<9x8xf32, #tpu.memory_space<vmem>>, %arg2: memref<1x8xf32, #tpu.memory_space<vmem>>) attributes {dimension_semantics = [], scalar_prefetch = 0 : i64, scratch_operands = 0 : i64, tpu.core_type = #tpu.core_type<tc>} {
    %c0 = arith.constant 0 : index
    %c0_0 = arith.constant 0 : index
    %0 = vector.load %arg1[%c0, %c0_0] : memref<9x8xf32, #tpu.memory_space<vmem>>, vector<9x8xf32>
    %1 = vector.extract_strided_slice %0 {offsets = [0, 0], sizes = [8, 8], strides = [1, 1]} : vector<9x8xf32> to vector<8x8xf32>
    %2 = vector.extract_strided_slice %0 {offsets = [8, 0], sizes = [1, 8], strides = [1, 1]} : vector<9x8xf32> to vector<1x8xf32>
    %c0_1 = arith.constant 0 : index
    %c0_2 = arith.constant 0 : index
    %3 = vector.load %arg0[%c0_1, %c0_2] : memref<1x8xf32, #tpu.memory_space<vmem>>, vector<1x8xf32>
    %cst = arith.constant dense<0.000000e+00> : vector<1x8xf32>
    %4 = tpu.matmul %3, %1, %cst {dimension_numbers = #tpu.dot_dimension_numbers<[1], [0], [0], [1], [0, 0, 1, 1], [], []>} : vector<1x8xf32>, vector<8x8xf32>, vector<1x8xf32> -> vector<1x8xf32>
    %5 = arith.addf %4, %2 : vector<1x8xf32>
    %c0_3 = arith.constant 0 : index
    %c0_4 = arith.constant 0 : index
    %6 = vector.load %arg2[%c0_3, %c0_4] : memref<1x8xf32, #tpu.memory_space<vmem>>, vector<1x8xf32>
    tpu.vector_store %arg2[%c0_3, %c0_4], %5 {strides = array<i32>} : memref<1x8xf32, #tpu.memory_space<vmem>>, vector<1x8xf32>,
    return
  }
}

</mosaic_0001>

<bundles_post_ra>
// kernel: _linear_cat_pallas.1
= control target key start
LH: loop header
LB: loop body
LE: loop exit
PB: predicated region body
PF: predicated region fallthrough
CT: control target
= control target key end

     0   :  { %vm15_vm0 = vcmask 64512   ;;  %v138_v2 = vmov 0.0   ;;  %vm139_vm1 = vmmov 0   ;;  %s168_s0 = inlined_call_operand.vmem [shape: f32[1,8], index: 0, kind: input, shape index: {}]   ;;  %s169_s1 = inlined_call_operand.vmem [shape: f32[9,8], index: 1, kind: input, shape index: {}]   ;;  %s170_s2 = inlined_call_operand.hbm [shape: f32[1,8], index: 2, kind: output, shape index: {}]  }
   0x1   :  { %v12_v0 = vld [vmem:[%s169_s1] sm:$0xff]  ;;  %108 = vmatprep.subr.mxu0 %v138_v2  ;;  %110 = vmatprep.mubr.msk.f32.mxu0 %vm139_vm1, %v138_v2 }
   0x2   :  { %v14_v1 = vld [vmem:[%s168_s0] sm:$0x1] }
   0x3   :  { %7 = vsyncpa [#allocation3], 0  ;;  %109 = vmatpush3.msra.mxu0 %v12_v0  ;;  %v13_v3 = vld [vmem:[%s169_s1 + $0x8] sm:$0x1]  ;;  %s140_s15 = smov [#allocation2]   ;;  %vm89_vm2 = vcmask 57344  }
   0x4   :  { %111 = vmatmul.mubr.msk.f32.vlgmr.msra.gmra.mxu0 %vm15_vm0, %v14_v1  ;;  %s97_s16 = sshll.u32 %s140_s15, 4  ;;  %s98_s16 = int_to_ptr.vmem [resolvable:$true] %s97_s16 }
   0x5   :  { %s116_s0 = scalar_lea.vmem %s98_s16, 16  ;;  %s120_s17 = scalar_lea.vmem %s98_s16, 32 }
   0x6   :  { %p117_p0 = scmp.ne.s32.totalorder %s98_s16, %s116_s0  ;;  %p121_p1 = scmp.lt.s32.totalorder %s98_s16, %s98_s16 }
   0x7   :  { %p122_p2 = scmp.lt.s32.totalorder %s120_s17, %s116_s0 }
   0x9   :  { %p123_p3 = por %p122_p2, %p121_p1 }
   0xb   :  { %p124_p4 = pnand %p123_p3, %p117_p0 }
  0xc4   :  { %v85_v4 = vpop.f32.mrf.mxu0 }
  0xc5   :  { %v86_v5 = vadd.f32 %v85_v4, %v13_v3 }
  0xc6   :  { %v112_v6 = vpop.f32.mrf.mxu0 }
  0xc7   :  { %90 = vst.msk [vmem:[#allocation2] sm:$0x1] %vm89_vm2, %v86_v5 }
  0xc8   :  { %127 = shalt.err (!%p124_p4)
}
  0xc9   :  { %100 = dma.vmem_to_hbm [thread:$0]  %s98_s16, 16, %s170_s2, [#allocation3]  }
  0xca   :  { %136 = dma.done.wait [#allocation3], 16  }
  0xcb   :  { %137 = vsyncadd [#allocation3], 4294967280 }
  0xcc   :  { %104 = vsyncpa [#allocation3], 1 }

</bundles_post_ra>
